<compile_context>
chip_gen: v7x
topology: tpu7x:2x2x1
jax: 0.10.0
libtpu: 0.0.40
codegen_flags: <defaults>
</compile_context>

<pallas_src>
import numpy as np
import jax
import jax.numpy as jnp
from jax.experimental import pallas as pl
from jax.experimental.pallas import tpu as pltpu


def _gelu_ref(t):
    # nn.GELU() default = exact (erf) gelu — used by the pure-JAX reference.
    return jax.nn.gelu(t, approximate=False)


# ---------------------------------------------------------------------------
# One-off hardware probes (outside the hot path).
# ---------------------------------------------------------------------------
_ROLL_SIGN = None


def _roll_sign():
    """Probe pltpu.roll's rotate direction once with a tiny pallas_call so the
    depthwise tap shifts are aligned correctly regardless of the convention."""
    global _ROLL_SIGN
    if _ROLL_SIGN is None:
        def probe(x_ref, o_ref):
            o_ref[...] = pltpu.roll(x_ref[...], 1, axis=1)

        xs = jnp.tile(jnp.arange(128, dtype=jnp.float32)[None, :], (8, 1))
        y = pl.pallas_call(
            probe, out_shape=jax.ShapeDtypeStruct((8, 128), jnp.float32))(xs)
        first = float(jax.device_get(y)[0, 0])
        # jnp.roll convention (result[j] = x[j - shift]) -> first == 127 -> shift = -s
        # opposite convention (result[j] = x[j + shift]) -> first == 1   -> shift = +s
        _ROLL_SIGN = -1 if first > 1.5 else 1
    return _ROLL_SIGN


def _bf16_elementwise_ok():
    """bf16 GELU/bias intermediates only on chips with a bf16 VPU/EUP (v6e/v7x)."""
    try:
        kind = jax.devices()[0].device_kind.lower()
    except Exception:
        return False
    return not any(t in kind for t in ("v2", "v3", "v4", "v5"))


# ---------------------------------------------------------------------------
# Pallas kernel: one Block step of the Stage on one (C, L) activation slab.
# Grid = (batch_tiles, num_blocks); the output block is revisited across the
# block axis and acts as the resident activation in VMEM.
# ---------------------------------------------------------------------------
def make_stage_kernel(*, C, N, L, G, K, P, roll_sign, bf16_act):

    def kernel(x_ref, dww_ref, w1a_ref, b1a_ref, w1b_ref,
               w2a_ref, b2a_ref, w2b_ref, b2b_ref, out_ref):
        blk = pl.program_id(1)

        # Seed the resident activation (the revisited output block) from the input.
        @pl.when(blk == 0)
        def _():
            out_ref[...] = x_ref[...]

        x = out_ref[...]                                  # (C, L) f32, stays in VMEM

        # --- reparam depthwise conv (large+small kernel; BNs + self.norm folded) ----
        # Shifts go through the XLU (pltpu.roll); per-lane masks emulate the zero
        # 'same' padding and stop taps leaking across the G packed batch segments
        # (this also kills the circular wrap of the roll at the slab edges).
        lane = jax.lax.broadcasted_iota(jnp.int32, (1, L), 1)
        w = dww_ref[...]                                  # (C, K) f32

        def tap(k):
            s = k - P                                     # tap offset in [-P, P]
            wk = w[:, k:k + 1]                            # (C, 1)
            if s == 0:
                return wk * x
            shifted = pltpu.roll(x, (roll_sign * s) % L, axis=1)  # shifted[j]=x[j+s]
            lo, hi = max(0, -s), min(N, N - s)
            m = None
            for g in range(G):
                seg = (lane >= g * N + lo) & (lane < g * N + hi)
                m = seg if m is None else (m | seg)
            return wk * jnp.where(m, shifted, 0.0)

        # Two accumulation chains -> more VALU ILP (no f32 FMA on v6e).
        acc0 = tap(0)
        acc1 = tap(1) if K > 1 else jnp.zeros_like(acc0)
        for k in range(2, K, 2):
            acc0 = acc0 + tap(k)
        for k in range(3, K, 2):
            acc1 = acc1 + tap(k)
        dw = acc0 + acc1
        # depthwise/norm bias is pre-folded into b1A (no extra (C, L) bias pass).

        # --- ffn1 (grouped 1x1 over nvars): bf16 MXU inputs, f32 accumulation -------
        z = jnp.dot(w1a_ref[...], dw.astype(jnp.bfloat16),
                    preferred_element_type=jnp.float32) + b1a_ref[...]
        if bf16_act:
            z = z.astype(jnp.bfloat16)                    # bf16 VPU/EUP path
        z = jax.nn.gelu(z, approximate=True)              # tanh form -> EUP slot
        h = jnp.dot(w1b_ref[...], z.astype(jnp.bfloat16),
                    preferred_element_type=jnp.float32)   # ffn1pw2 bias folded in b2A

        # --- ffn2 (grouped 1x1 over dmodel; channel permutes folded into weights) ---
        u = jnp.dot(w2a_ref[...], h.astype(jnp.bfloat16),
                    preferred_element_type=jnp.float32) + b2a_ref[...]
        if bf16_act:
            u = u.astype(jnp.bfloat16)
        u = jax.nn.gelu(u, approximate=True)
        v = jnp.dot(w2b_ref[...], u.astype(jnp.bfloat16),
                    preferred_element_type=jnp.float32) + b2b_ref[...]

        # --- residual ----------------------------------------------------------------
        out_ref[...] = x + v                              # L % 128 == 0 -> unmasked vst

    return kernel


# ---------------------------------------------------------------------------
# Wrapper: grid / BlockSpecs / lane packing.
# ---------------------------------------------------------------------------
def stage_forward(x, block_params, lane_batch=None):
    """x: (B, M, D, N) float32; block_params: list (len=num_blocks) of dense dicts."""
    B, M, D, N = x.shape
    C = M * D
    nb = len(block_params)
    stacked = {k: jnp.stack([p[k] for p in block_params], axis=0)
               for k in block_params[0]}
    K = int(stacked["dww"].shape[-1])
    P = K // 2
    Mdff = int(stacked["W1A"].shape[1])

    # Lane widening: pack G batch elements side-by-side on lanes (target ~512 lanes).
    # (On v7x with batch-tiles == 1 one TC idles; tune `lane_batch` there.)
    if lane_batch is None:
        lane_batch = 1
        for g in range(min(B, max(1, 512 // N)), 0, -1):
            if B % g == 0:
                lane_batch = g
                break
    G = lane_batch
    BT = B // G
    L = G * N

    # (B, M, D, N) -> (BT, C, G*N): pure layout plumbing outside the hot loop.
    xl = (x.reshape(B, C, N).reshape(BT, G, C, N)
           .transpose(0, 2, 1, 3).reshape(BT, C, L))

    names = ["dww", "W1A", "b1A", "W1B", "W2A", "b2A", "W2B", "b2B"]
    args = [stacked[n] for n in names]

    x_spec = pl.BlockSpec((None, C, L), lambda bt, blk: (bt, 0, 0))
    out_spec = pl.BlockSpec((None, C, L), lambda bt, blk: (bt, 0, 0))
    # Per-block weights streamed along the block axis (double-buffered by the pipeline).
    w_specs = [pl.BlockSpec((None,) + tuple(a.shape[1:]), lambda bt, blk: (blk, 0, 0))
               for a in args]

    # VMEM budget: double-buffered activation blocks + ~2 blocks of streamed weights.
    per_block_w = sum(int(a.size) * a.dtype.itemsize for a in args) // nb
    vmem_need = 4 * C * L * 4 + 2 * per_block_w + (4 << 20)
    vmem_limit = int(min(max(vmem_need, 32 << 20), 64 << 20))

    flops = BT * nb * (2 * C * L * K + 8 * Mdff * C * L)
    transc = BT * nb * 2 * Mdff * L
    bytes_acc = 2 * B * C * N * 4 + BT * sum(int(a.size) * a.dtype.itemsize for a in args)

    kernel = make_stage_kernel(C=C, N=N, L=L, G=G, K=K, P=P,
                               roll_sign=_roll_sign(),
                               bf16_act=_bf16_elementwise_ok())

    out = pl.pallas_call(
        kernel,
        out_shape=jax.ShapeDtypeStruct((BT, C, L), jnp.float32),
        grid=(BT, nb),
        in_specs=[x_spec] + w_specs,
        out_specs=out_spec,
        compiler_params=pltpu.CompilerParams(
            dimension_semantics=("parallel", "arbitrary"),
            vmem_limit_bytes=vmem_limit,
        ),
        cost_estimate=pl.CostEstimate(flops=int(flops),
                                      transcendentals=int(transc),
                                      bytes_accessed=int(bytes_acc)),
    )(xl, *args)

    y = (out.reshape(BT, C, G, N).transpose(0, 2, 1, 3)
            .reshape(B, C, N).reshape(B, M, D, N))
    return y


# ---------------------------------------------------------------------------
# Deterministic parameter construction (glue), shapes per the PyTorch module,
# with all inference-mode foldings done here (outside the hot path).
# ---------------------------------------------------------------------------
def init_block_params(key, M, D, dff, K, Ks):
    C = M * D
    ratio = dff // D
    F2 = M * ratio
    Mdff = M * dff                 # == D * F2
    eps = 1e-5
    ks = jax.random.split(key, 16)

    def nrm(k, shape, scale=0.2):
        return scale * jax.random.normal(k, shape, jnp.float32)

    def bn_params(k, n):
        k1, k2, k3, k4 = jax.random.split(k, 4)
        gamma = 1.0 + 0.1 * jax.random.normal(k1, (n,), jnp.float32)
        beta = 0.1 * jax.random.normal(k2, (n,), jnp.float32)
        mean = 0.1 * jax.random.normal(k3, (n,), jnp.float32)
        var = jax.nn.softplus(jax.random.normal(k4, (n,), jnp.float32)) + 0.5
        return gamma, beta, mean, var

    # depthwise convs (lkb_origin + small_conv), conv bias=False, each followed by BN
    lk_w = nrm(ks[0], (C, K), 0.3)
    sk_w = nrm(ks[1], (C, Ks), 0.3)
    lk_bn, sk_bn, norm_bn = bn_params(ks[2], C), bn_params(ks[3], C), bn_params(ks[4], D)

    def fuse(wk, bn):
        g, b, m, v = bn
        t = g / jnp.sqrt(v + eps)
        return wk * t[:, None], b - m * t

    lkf_w, lkf_b = fuse(lk_w, lk_bn)
    skf_w, skf_b = fuse(sk_w, sk_bn)
    pad = (K - Ks) // 2
    eq_k = lkf_w + jnp.pad(skf_w, ((0, 0), (pad, pad)))   # == lkb_origin(x)+small_conv(x)
    eq_b = lkf_b + skf_b

    g, b, m, v = norm_bn
    ns_d = g / jnp.sqrt(v + eps)
    nb_d = b - m * ns_d
    ns = jnp.tile(ns_d, M)       # channel c = m*D + d  ->  per-d affine tiled over m
    nbv = jnp.tile(nb_d, M)

    # grouped pointwise convs (PyTorch weight shapes with trailing k=1 squeezed)
    w1a = nrm(ks[5], (Mdff, D));  b1a = nrm(ks[6], (Mdff,), 0.1)   # ffn1pw1, groups=M
    w1b = nrm(ks[7], (C, dff));   b1b = nrm(ks[8], (C,), 0.1)      # ffn1pw2, groups=M
    w2a = nrm(ks[9], (Mdff, M));  b2a = nrm(ks[10], (Mdff,), 0.1)  # ffn2pw1, groups=D
    w2b = nrm(ks[11], (C, F2));   b2b = nrm(ks[12], (C,), 0.1)     # ffn2pw2, groups=D

    # ---- foldings (inference BN semantics), computed in f32 ----------------------
    # self.norm affine folded into the reparam depthwise conv:
    dww = np.asarray(eq_k) * np.asarray(ns)[:, None]               # (C, K)
    dwb = np.asarray(eq_b) * np.asarray(ns) + np.asarray(nbv)      # (C,)

    # Dense block-structured embeddings of the grouped 1x1 convs in the fixed
    # (m*D + d) channel layout (ffn2's permutes folded into W2A/W2B).
    w1a_n, w1b_n = np.asarray(w1a), np.asarray(w1b)
    w2a_n, w2b_n = np.asarray(w2a), np.asarray(w2b)
    W1A = np.zeros((Mdff, C), np.float32)
    W1B = np.zeros((C, Mdff), np.float32)
    for mm in range(M):
        W1A[mm * dff:(mm + 1) * dff, mm * D:(mm + 1) * D] = w1a_n[mm * dff:(mm + 1) * dff]
        W1B[mm * D:(mm + 1) * D, mm * dff:(mm + 1) * dff] = w1b_n[mm * D:(mm + 1) * D]
    W2A = np.zeros((Mdff, C), np.float32)   # includes the (M,D)->(D,M) permute
    W2B = np.zeros((C, Mdff), np.float32)   # and the permute back
    for dd in range(D):
        for mm in range(M):
            W2A[dd * F2:(dd + 1) * F2, mm * D + dd] = w2a_n[dd * F2:(dd + 1) * F2, mm]
            W2B[mm * D + dd, dd * F2:(dd + 1) * F2] = w2b_n[dd * M + mm]
    b2B = np.asarray(b2b).reshape(D, M).T.reshape(C)

    # Per-channel bias folding (exact):
    #   depthwise+norm bias -> ffn1pw1 bias;  ffn1pw2 bias -> ffn2pw1 bias.
    b1A = np.asarray(b1a) + W1A @ dwb
    b2A = np.asarray(b2a) + W2A @ np.asarray(b1b)

    dense = dict(
        dww=jnp.asarray(dww, jnp.float32),
        W1A=jnp.asarray(W1A, jnp.bfloat16), b1A=jnp.asarray(b1A[:, None], jnp.float32),
        W1B=jnp.asarray(W1B, jnp.bfloat16),
        W2A=jnp.asarray(W2A, jnp.bfloat16), b2A=jnp.asarray(b2A[:, None], jnp.float32),
        W2B=jnp.asarray(W2B, jnp.bfloat16), b2B=jnp.asarray(b2B[:, None], jnp.float32),
    )
    raw = dict(eq_k=eq_k, eq_b=eq_b, ns=ns, nb=nbv,
               w1a=w1a, b1a=b1a, w1b=w1b, b1b=b1b,
               w2a=w2a, b2a=b2a, w2b=w2b, b2b=b2b)
    return dense, raw


# ---------------------------------------------------------------------------
# Pure-JAX reference mirroring the PyTorch grouped-conv structure (f32, erf GELU).
# ---------------------------------------------------------------------------
def block_ref_grouped(x, raw, M, D, dff):
    B, _, _, N = x.shape
    C = M * D
    F2 = M * (dff // D)
    K = raw["eq_k"].shape[1]
    P = K // 2

    xc = x.reshape(B, C, N)
    xp = jnp.pad(xc, ((0, 0), (0, 0), (P, P)))
    dw = jnp.zeros_like(xc)
    for k in range(K):
        dw = dw + raw["eq_k"][None, :, k:k + 1] * xp[:, :, k:k + N]
    dw = dw + raw["eq_b"][None, :, None]
    y = dw * raw["ns"][None, :, None] + raw["nb"][None, :, None]

    y4 = y.reshape(B, M, D, N)
    w1a = raw["w1a"].reshape(M, dff, D)
    z = _gelu_ref(jnp.einsum("mfd,bmdn->bmfn", w1a, y4)
                  + raw["b1a"].reshape(M, dff)[None, :, :, None])
    w1b = raw["w1b"].reshape(M, D, dff)
    h = jnp.einsum("mdf,bmfn->bmdn", w1b, z) + raw["b1b"].reshape(M, D)[None, :, :, None]

    w2a = raw["w2a"].reshape(D, F2, M)
    u = _gelu_ref(jnp.einsum("dfm,bmdn->bdfn", w2a, h)
                  + raw["b2a"].reshape(D, F2)[None, :, :, None])
    w2b = raw["w2b"].reshape(D, M, F2)
    v = jnp.einsum("dmf,bdfn->bmdn", w2b, u) + raw["b2b"].reshape(D, M).T[None, :, :, None]
    return x + v


if __name__ == "__main__":
    # Stage hyper-params (small but TPU-friendly: N multiple of 128 -> lane-dense I/O)
    B, M, D, N = 2, 4, 16, 128          # batch, nvars, dmodel, seq length
    ffn_ratio, num_blocks = 2, 2
    large_size, small_size = 9, 5
    dff = D * ffn_ratio

    key = jax.random.PRNGKey(0)
    kx, kp = jax.random.split(key)
    x = jax.random.normal(kx, (B, M, D, N), jnp.float32)

    blocks = [init_block_params(jax.random.fold_in(kp, i), M, D, dff,
                                large_size, small_size)
              for i in range(num_blocks)]

    out = stage_forward(x, [dense for dense, _ in blocks])
    out = jax.block_until_ready(out)

    ref = x
    for _, raw in blocks:
        ref = block_ref_grouped(ref, raw, M, D, dff)
    np.testing.assert_allclose(np.asarray(out), np.asarray(ref), rtol=2e-2, atol=2e-2)

    print("KERNEL_OK")
</pallas_src>

<mosaic_0001>
module attributes {stable_mosaic.version = 11 : i64} {
  func.func @probe(%arg0: memref<8x128xf32, #tpu.memory_space<vmem>>, %arg1: memref<8x128xf32, #tpu.memory_space<vmem>>) attributes {dimension_semantics = [], scalar_prefetch = 0 : i64, scratch_operands = 0 : i64, tpu.core_type = #tpu.core_type<tc>} {
    %c0 = arith.constant 0 : index
    %c0_0 = arith.constant 0 : index
    %0 = vector.load %arg0[%c0, %c0_0] : memref<8x128xf32, #tpu.memory_space<vmem>>, vector<8x128xf32>
    %c1_i32 = arith.constant 1 : i32
    %1 = tpu.dynamic_rotate %0 by %c1_i32 dim 1 : vector<8x128xf32>, i32 -> vector<8x128xf32>
    %c0_1 = arith.constant 0 : index
    %c0_2 = arith.constant 0 : index
    %2 = vector.load %arg1[%c0_1, %c0_2] : memref<8x128xf32, #tpu.memory_space<vmem>>, vector<8x128xf32>
    tpu.vector_store %arg1[%c0_1, %c0_2], %1 {strides = array<i32>} : memref<8x128xf32, #tpu.memory_space<vmem>>, vector<8x128xf32>,
    return
  }
}

</mosaic_0001>

<bundles_post_ra>
// kernel: tpu_custom_call.1
= control target key start
LH: loop header
LB: loop body
LE: loop exit
PB: predicated region body
PF: predicated region fallthrough
CT: control target
= control target key end

     0   :  { %6 = vsyncpa [#allocation3], 0  ;;  %s128_s0 = inlined_call_operand.hbm [shape: f32[8,128], index: 0, kind: input, shape index: {}]   ;;  %s129_s1 = inlined_call_operand.hbm [shape: f32[8,128], index: 1, kind: output, shape index: {}]  }
   0x1   :  { %7 = vsyncpa [#allocation4], 0  ;;  %s91_s6 = smov [#allocation2]   ;;  %s43_s10 = scalar_lea.hbm %s128_s0, 128 }
   0x2   :  { %s14_s7 = sshll.u32 %s91_s6, 4  ;;  %p44_p0 = scmp.ne.s32.totalorder %s128_s0, %s43_s10  ;;  %s15_s7 = int_to_ptr.vmem [resolvable:$true] %s14_s7 }
   0x3   :  { %p47_p1 = scmp.lt.u32.totalorder %s43_s10, %s128_s0 }
   0x5   :  { %p49_p2 = pnand %p47_p1, %p44_p0 }
   0x7   :  { %52 = shalt.err (!%p49_p2)
}
   0x8   :  { %s53_s15 = scalar_lea.vmem %s15_s7, 128  ;;  %p58_p4 = scmp.lt.s32.totalorder %s15_s7, %s15_s7 }
   0x9   :  { %p54_p3 = scmp.ne.s32.totalorder %s15_s7, %s53_s15  ;;  %p59_p5 = scmp.lt.s32.totalorder %s53_s15, %s53_s15 }
   0xb   :  { %p60_p6 = por %p59_p5, %p58_p4 }
   0xd   :  { %p61_p7 = pnand %p60_p6, %p54_p3 }
   0xf   :  { %64 = shalt.err (!%p61_p7)
}
  0x10   :  { %17 = dma.hbm_to_vmem [thread:$0]  %s128_s0, 128, %s15_s7, [#allocation3]  }
  0x11   :  { %87 = dma.done.wait [#allocation3], 128  }
  0x12   :  { %88 = vsyncadd [#allocation3], 4294967168  ;;  %v21_v0 = vld [vmem:[#allocation2] sm:$0xff]  ;;  %s92_s18 = smov 1   ;;  %s93_s19 = smov [#allocation5]  }
  0x13   :  { %22 = vrot.lane.b32.xlu0 %v21_v0, %s92_s18  ;;  %s31_s20 = sshll.u32 %s93_s19, 4  ;;  %s32_s20 = int_to_ptr.vmem [resolvable:$true] %s31_s20 }
  0x14   :  { %s65_s21 = scalar_lea.vmem %s32_s20, 128  ;;  %p70_p9 = scmp.lt.s32.totalorder %s32_s20, %s32_s20 }
  0x15   :  { %p66_p8 = scmp.ne.s32.totalorder %s32_s20, %s65_s21  ;;  %p71_p10 = scmp.lt.s32.totalorder %s65_s21, %s65_s21 }
  0x17   :  { %p72_p11 = por %p71_p10, %p70_p9 }
  0x19   :  { %p73_p12 = pnand %p72_p11, %p66_p8 }
  0x85   :  { %v23_v1 = vpop.permute.xlu0 %22 }
  0x86   :  { %24 = vst [vmem:[#allocation5] sm:$0xff] %v23_v1 }
  0x87   :  { %76 = shalt.err (!%p73_p12)
}
  0x88   :  { %s77_s0 = scalar_lea.hbm %s129_s1, 128 }
  0x89   :  { %p78_p13 = scmp.ne.s32.totalorder %s129_s1, %s77_s0  ;;  %p81_p0 = scmp.lt.u32.totalorder %s77_s0, %s129_s1 }
  0x8b   :  { %p83_p1 = pnand %p81_p0, %p78_p13 }
  0x8d   :  { %86 = shalt.err (!%p83_p1)
}
  0x8e   :  { %34 = dma.vmem_to_hbm [thread:$0]  %s32_s20, 128, %s129_s1, [#allocation4]  }
  0x8f   :  { %89 = dma.done.wait [#allocation4], 128  }
  0x90   :  { %90 = vsyncadd [#allocation4], 4294967168 }
  0x91   :  { %38 = vsyncpa [#allocation3], 1 }
  0x92   :  { %39 = vsyncpa [#allocation4], 1 }

</bundles_post_ra>
